<compile_context>
chip_gen: v7x
topology: tpu7x:2x2x1
jax: 0.10.0
libtpu: 0.0.40
codegen_flags: <defaults>
</compile_context>

<pallas_src>
import functools
import math

import jax
import jax.numpy as jnp
from jax.experimental import pallas as pl
from jax.experimental.pallas import tpu as pltpu


def _round_up(x, m):
    return (x + m - 1) // m * m


def _mxu_contraction_multiple():
    """128 on v5-class MXUs (128x128 tiles), 256 on v6e/v7x (256-wide)."""
    try:
        kind = jax.devices()[0].device_kind.lower()
    except Exception:
        return 256
    return 128 if "v5" in kind else 256


def _cat_embed_kernel(entrez_pad, apply_relu, apply_dropout, *refs):
    """One batch tile of indices: one-hot MXU gather + relu (+ dropout mask)."""
    if apply_dropout:
        idx_ref, table_ref, mask_ref, out_ref = refs
    else:
        idx_ref, table_ref, out_ref = refs
        mask_ref = None

    idx = idx_ref[...]                                          # (TB, 1) int32
    tb = idx.shape[0]

    # One-hot gather on the MXU: (TB, entrez_pad) @ (entrez_pad, emb_sz).
    # One-hot is built directly in the (bf16) matmul dtype; f32 accumulation
    # is exact for a one-hot contraction.
    lanes = jax.lax.broadcasted_iota(jnp.int32, (tb, entrez_pad), 1)
    onehot = (lanes == idx).astype(table_ref.dtype)
    out = jnp.dot(onehot, table_ref[...], preferred_element_type=jnp.float32)

    if apply_relu:
        out = jnp.maximum(out, 0.0)
    if apply_dropout:
        out = out * mask_ref[...]          # precomputed inverted-dropout mask

    out_ref[...] = out.astype(out_ref.dtype)


class CatEmbedder:
    """Pallas equivalent of CatEmbedder (frozen nn.Embedding dict + concat)."""

    def __init__(self, tables, *, nonlin="relu", emb_dropout=0.0,
                 table_dtype=jnp.bfloat16, out_dtype=jnp.float32):
        # `tables` must already be ordered by sorted embedding-type name
        # (self.emb_names = sorted(args.embedding_type) in the torch module).
        self.n_emb = len(tables)
        self.entrez_size, self.emb_size = tables[0].shape
        self.emb_sz = self.n_emb * self.emb_size
        self.nonlin = nonlin
        self.emb_dropout = float(emb_dropout)
        self.out_dtype = out_dtype

        # Hoisted out of forward: concat along the feature dim + MXU-aligned
        # row padding + bf16 storage (halves VMEM residency and MXU passes).
        self.entrez_pad = _round_up(self.entrez_size, _mxu_contraction_multiple())
        big = jnp.concatenate([t.astype(table_dtype) for t in tables], axis=-1)
        self.big_table = jnp.pad(
            big, ((0, self.entrez_pad - self.entrez_size), (0, 0)))
        # TODO(synk): for large entrez_size (table no longer fits ~48 MiB of
        # v7x's 64 MiB VMEM), switch to a scalar-prefetch / DMA row-gather or
        # K-tile the one-hot matmul with a VMEM f32 accumulator.

    def __call__(self, idx, *, training=False, rng=None, tile_b=512):
        idx_in = jnp.asarray(idx)
        scalar_input = (idx_in.ndim == 0)
        idx_arr = jnp.atleast_1d(idx_in).astype(jnp.int32)
        B = idx_arr.shape[0]

        # Clamp: the one-hot gather has no bounds check (OOB -> zero row).
        # TODO(synk): torch raises KeyError on unknown entrez; we clamp instead.
        idx_arr = jnp.clip(idx_arr, 0, self.entrez_size - 1)

        # Batch tile: sublane-dense for small B; 128-multiples and >= 2 grid
        # steps for large B so a 2-TC chip (v7x) shards the "parallel" axis.
        if B <= 128:
            TB = _round_up(B, 8)
        else:
            TB = min(tile_b, _round_up(pl.cdiv(B, 2), 128))
        B_pad = _round_up(B, TB)
        idx_pad = jnp.zeros((B_pad, 1), jnp.int32).at[:B, 0].set(idx_arr)

        apply_relu = (self.nonlin == "relu")
        apply_dropout = bool(training and self.emb_dropout > 0.0)

        inputs = [idx_pad, self.big_table]
        in_specs = [
            # (TB, 1) tile of indices per grid step.
            pl.BlockSpec((TB, 1), lambda b: (b, 0)),
            # Full table, constant block index -> loaded once, VMEM-resident;
            # single buffer (no point double-buffering a constant block).
            pl.BlockSpec((self.entrez_pad, self.emb_sz), lambda b: (0, 0),
                         pipeline_mode=pl.Buffered(1)),
        ]

        if apply_dropout:
            # TODO(synk): torch.nn.Dropout RNG stream is not reproducible; the
            # inverted-dropout mask is drawn with jax.random in the wrapper
            # (pltpu.prng_* is TPU-only and breaks interpret mode) and applied
            # as a fused multiply inside the kernel.
            if rng is None:
                rng = jax.random.PRNGKey(0)
            keep_prob = 1.0 - self.emb_dropout
            keep = jax.random.bernoulli(rng, keep_prob, (B_pad, self.emb_sz))
            mask = keep.astype(jnp.float32) * (1.0 / keep_prob)
            inputs.append(mask)
            in_specs.append(pl.BlockSpec((TB, self.emb_sz), lambda b: (b, 0)))

        kernel = functools.partial(
            _cat_embed_kernel, self.entrez_pad, apply_relu, apply_dropout)

        grid = (B_pad // TB,)
        out_itemsize = jnp.dtype(self.out_dtype).itemsize
        tbl_itemsize = jnp.dtype(self.big_table.dtype).itemsize
        table_bytes = self.entrez_pad * self.emb_sz * tbl_itemsize

        # Scoped-VMEM budget: resident table (x1, Buffered(1)) + double-buffered
        # idx/out (/mask) tiles + one-hot intermediate + headroom.
        vmem_need = (table_bytes
                     + 2 * TB * 128 * 4
                     + 2 * TB * self.emb_sz * out_itemsize
                     + (2 * TB * self.emb_sz * 4 if apply_dropout else 0)
                     + TB * self.entrez_pad * tbl_itemsize
                     + (8 << 20))
        vmem_limit = int(min(max(vmem_need, 32 << 20), 100 << 20))

        cost = pl.CostEstimate(
            flops=2 * B_pad * self.entrez_pad * self.emb_sz,
            transcendentals=0,
            bytes_accessed=(table_bytes                              # table (once)
                            + B_pad * self.emb_sz * out_itemsize     # output
                            + B_pad * 4                              # indices
                            + (B_pad * self.emb_sz * 4 if apply_dropout else 0)))

        out = pl.pallas_call(
            kernel,
            out_shape=jax.ShapeDtypeStruct((B_pad, self.emb_sz), self.out_dtype),
            grid=grid,
            in_specs=in_specs,
            out_specs=pl.BlockSpec((TB, self.emb_sz), lambda b: (b, 0)),
            compiler_params=pltpu.CompilerParams(
                dimension_semantics=("parallel",),
                vmem_limit_bytes=vmem_limit),
            cost_estimate=cost,
        )(*inputs)

        out = out[:B]
        return out[0] if scalar_input else out


def init_single_embedder(key, entrez_size, emb_size, matched_fraction=0.5):
    """Deterministic emulation of SingleEmbedder.__init__ (no file loads).

    uniform(-sqrt(3/E), sqrt(3/E)) init -> copy synthetic 'pretrained' rows for
    matched indices -> subtract mean over matched rows -> zero missed rows.
    """
    bound = math.sqrt(3.0 / emb_size)
    k1, k2 = jax.random.split(key)
    w = jax.random.uniform(k1, (entrez_size, emb_size), jnp.float32, -bound, bound)

    n_matched = max(1, int(entrez_size * matched_fraction))
    matched = jnp.arange(n_matched)
    missed = jnp.arange(n_matched, entrez_size)

    pretrained = 0.1 * jax.random.normal(k2, (n_matched, emb_size), jnp.float32)
    w = w.at[matched].set(pretrained)

    # normalize_embeddings
    w = w - w[matched].mean(0)
    w = w.at[missed].set(0.0)
    return w


if __name__ == "__main__":
    # Small config consistent with CatEmbedder: args.entrez_size, args.emb_size,
    # args.embedding_type (n_emb names), args.nonlin='relu', args.emb_dropout.
    entrez_size = 40
    emb_size = 128
    emb_names = sorted(["bp", "cc", "mf"])   # self.emb_names = sorted(embedding_type)
    nonlin = "relu"
    emb_dropout = 0.1                        # eval mode -> identity

    entrez_to_idx = {f"ENTREZ_{i}": i for i in range(entrez_size)}

    key = jax.random.PRNGKey(0)
    keys = jax.random.split(key, len(emb_names))
    tables = [init_single_embedder(k, entrez_size, emb_size) for k in keys]
    emb_sz = len(emb_names) * emb_size

    cat = CatEmbedder(tables, nonlin=nonlin, emb_dropout=emb_dropout,
                      table_dtype=jnp.bfloat16, out_dtype=jnp.float32)

    # Reference tables: the kernel stores/gathers the table in bf16, so the
    # reference uses the bf16-rounded values (gather itself is exact).
    tables_ref = [t.astype(jnp.bfloat16).astype(jnp.float32) for t in tables]

    # Single entrez lookup (matches CatEmbedder.forward(entrez)).
    entrez = "ENTREZ_3"
    idx = entrez_to_idx[entrez]
    out = jax.block_until_ready(cat(idx, training=False))
    assert out.shape == (emb_sz,)
    ref = jnp.maximum(jnp.concatenate([t[idx] for t in tables_ref], -1), 0.0)
    assert jnp.allclose(out, ref, atol=1e-6), "mismatch vs reference"

    # Batched lookup path (same kernel, one sublane-dense tile).
    batch_idx = jnp.array([0, 3, 7, 39, 12, 1, 25, 38, 9, 17], dtype=jnp.int32)
    out_b = jax.block_until_ready(cat(batch_idx, training=False))
    ref_b = jnp.maximum(
        jnp.concatenate([t[batch_idx] for t in tables_ref], -1), 0.0)
    assert out_b.shape == (batch_idx.shape[0], emb_sz)
    assert jnp.allclose(out_b, ref_b, atol=1e-6), "batched mismatch vs reference"

    # Training-mode dropout path: every element must be either 0 or
    # ref / keep_prob (structural invariant of inverted dropout).
    p = 0.25
    cat_train = CatEmbedder(tables, nonlin=nonlin, emb_dropout=p,
                            table_dtype=jnp.bfloat16, out_dtype=jnp.float32)
    out_t = jax.block_until_ready(
        cat_train(batch_idx, training=True, rng=jax.random.PRNGKey(123)))
    scaled = ref_b / (1.0 - p)
    ok = jnp.all(jnp.isclose(out_t, 0.0, atol=1e-6)
                 | jnp.isclose(out_t, scaled, atol=1e-5))
    assert bool(ok), "dropout output not {0, x/keep_prob}-patterned"

    print("KERNEL_OK")
</pallas_src>

<mosaic_0001>
module attributes {stable_mosaic.version = 11 : i64} {
  func.func @_cat_embed_kernel(%arg0: i32, %arg1: memref<8x1xi32, #tpu.memory_space<vmem>>, %arg2: memref<256x384xbf16, #tpu.memory_space<vmem>>, %arg3: memref<8x384xf32, #tpu.memory_space<vmem>>) attributes {dimension_semantics = [#tpu.dimension_semantics<parallel>], iteration_bounds = array<i64: 1>, scalar_prefetch = 0 : i64, scratch_operands = 0 : i64, tpu.core_type = #tpu.core_type<tc>, window_params = [{transform_indices = @transform_0, window_bounds = array<i64: 8, 1>}, {pipeline_mode = #tpu.pipeline_mode<synchronous>, transform_indices = @transform_1, window_bounds = array<i64: 256, 384>}, {transform_indices = @transform_2, window_bounds = array<i64: 8, 384>}]} {
    %c0 = arith.constant 0 : index
    %c0_0 = arith.constant 0 : index
    %0 = vector.load %arg1[%c0, %c0_0] : memref<8x1xi32, #tpu.memory_space<vmem>>, vector<8x1xi32>
    %1 = tpu.iota {dimensions = array<i32: 1>} : vector<8x256xi32>
    %2 = vector.broadcast %0 : vector<8x1xi32> to vector<8x256xi32>
    %3 = arith.cmpi eq, %1, %2 : vector<8x256xi32>
    %4 = arith.extui %3 : vector<8x256xi1> to vector<8x256xi32>
    %5 = arith.sitofp %4 : vector<8x256xi32> to vector<8x256xf32>
    %6 = arith.truncf %5 : vector<8x256xf32> to vector<8x256xbf16>
    %c0_1 = arith.constant 0 : index
    %c0_2 = arith.constant 0 : index
    %7 = vector.load %arg2[%c0_1, %c0_2] : memref<256x384xbf16, #tpu.memory_space<vmem>>, vector<256x384xbf16>
    %cst = arith.constant dense<0.000000e+00> : vector<8x384xf32>
    %8 = tpu.matmul %6, %7, %cst {dimension_numbers = #tpu.dot_dimension_numbers<[1], [0], [0], [1], [0, 0, 1, 1], [], []>} : vector<8x256xbf16>, vector<256x384xbf16>, vector<8x384xf32> -> vector<8x384xf32>
    %cst_3 = arith.constant 0.000000e+00 : f32
    %9 = vector.broadcast %cst_3 : f32 to vector<8x384xf32>
    %10 = arith.maximumf %8, %9 : vector<8x384xf32>
    %c0_4 = arith.constant 0 : index
    %c0_5 = arith.constant 0 : index
    %11 = vector.load %arg3[%c0_4, %c0_5] : memref<8x384xf32, #tpu.memory_space<vmem>>, vector<8x384xf32>
    tpu.vector_store %arg3[%c0_4, %c0_5], %10 {strides = array<i32>} : memref<8x384xf32, #tpu.memory_space<vmem>>, vector<8x384xf32>,
    return
  }
  func.func @transform_0(%arg0: i32) -> (i32, i32) {
    %c0_i32 = arith.constant 0 : i32
    %c0_i32_0 = arith.constant 0 : i32
    return %arg0, %c0_i32 : i32, i32
  }
  func.func @transform_1(%arg0: i32) -> (i32, i32) {
    %c0_i32 = arith.constant 0 : i32
    %c0_i32_0 = arith.constant 0 : i32
    %c0_i32_1 = arith.constant 0 : i32
    return %c0_i32, %c0_i32_0 : i32, i32
  }
  func.func @transform_2(%arg0: i32) -> (i32, i32) {
    %c0_i32 = arith.constant 0 : i32
    %c0_i32_0 = arith.constant 0 : i32
    return %arg0, %c0_i32 : i32, i32
  }
}

</mosaic_0001>

<bundles_post_ra>
// kernel: tpu_custom_call.1
= control target key start
LH: loop header
LB: loop body
LE: loop exit
PB: predicated region body
PF: predicated region fallthrough
CT: control target
= control target key end

     0   :  { %7 = vsyncpa [#allocation3], 0  ;;  %s711_s0 = inlined_call_operand.vmem [shape: s32[8,1], index: 0, kind: input, shape index: {}]   ;;  %s712_s1 = inlined_call_operand.hbm [shape: bf16[256,384], index: 1, kind: input, shape index: {}]   ;;  %s713_s2 = inlined_call_operand.hbm [shape: f32[8,384], index: 2, kind: output, shape index: {}]  }
   0x1   :  { %8 = vsyncpa [#allocation4], 0  ;;  %s663_s9 = smov [#allocation2]   ;;  %s615_s13 = scalar_lea.hbm %s712_s1, 6144 }
   0x2   :  { %s16_s10 = sshll.u32 %s663_s9, 4  ;;  %p616_p0 = scmp.ne.s32.totalorder %s712_s1, %s615_s13  ;;  %s17_s10 = int_to_ptr.vmem [resolvable:$true] %s16_s10 }
   0x3   :  { %p619_p1 = scmp.lt.u32.totalorder %s615_s13, %s712_s1 }
   0x5   :  { %p621_p2 = pnand %p619_p1, %p616_p0 }
   0x7   :  { %624 = shalt.err (!%p621_p2)
}
   0x8   :  { %s625_s18 = scalar_lea.vmem %s17_s10, 6144  ;;  %p630_p4 = scmp.lt.s32.totalorder %s17_s10, %s17_s10 }
   0x9   :  { %p626_p3 = scmp.ne.s32.totalorder %s17_s10, %s625_s18  ;;  %p631_p5 = scmp.lt.s32.totalorder %s625_s18, %s625_s18 }
   0xb   :  { %p632_p6 = por %p631_p5, %p630_p4 }
   0xd   :  { %p633_p7 = pnand %p632_p6, %p626_p3 }
   0xf   :  { %636 = shalt.err (!%p633_p7)
}
  0x10   :  { %s664_s19 = smov 192   ;;  %s665_s20 = smov 12  }
  0x11   :  { %22 = dma.hbm_to_vmem [thread:$0]  %s712_s1, 6144, %s17_s10, [#allocation3], %s664_s19, %s664_s19, %s665_s20  }
  0x12   :  { %659 = dma.done.wait [#allocation3], 6144  }
  0x13   :  { %660 = vsyncadd [#allocation3], 4294961152  ;;  %v666_v0 = vmov 0   ;;  %v27_v1 = vld [vmem:[%s711_s0] sm:$0xff]  ;;  %v554_v4 = vld [vmem:[#allocation2 + $0x1c] ss:$12 sps:$4 sm:$0xff]   ;;  %v28_v50 = vlaneseq }
  0x14   :  { %550 = vset.pattern.permute.xlu0 %v666_v0  ;;  %v551_v2 = vld [vmem:[#allocation2 + $0x4] ss:$12 sps:$4 sm:$0xff]   ;;  %v553_v3 = vld [vmem:[#allocation2] ss:$12 sps:$4 sm:$0xff]   ;;  %v562_v9 = vld [vmem:[#allocation2 + $0x48] ss:$12 sps:$4 sm:$0xff]  }
  0x15   :  { %32 = vperm.xlu0 %550, %v27_v1   ;;  %362 = vmatprep.subr.bf16.mxu0 %v551_v2  ;;  %v556_v5 = vld [vmem:[#allocation2 + $0x18] ss:$12 sps:$4 sm:$0xff]   ;;  %v557_v6 = vld [vmem:[#allocation2 + $0x34] ss:$12 sps:$4 sm:$0xff]   ;;  %v559_v7 = vld [vmem:[#allocation2 + $0x30] ss:$12 sps:$4 sm:$0xff]  }
  0x16   :  { %363 = vmatpush1.bf16.msra.mxu0 %v553_v3  ;;  %v560_v8 = vld [vmem:[#allocation2 + $0x4c] ss:$12 sps:$4 sm:$0xff]   ;;  %v577_v10 = vld [vmem:[#allocation2 + $0xc8] ss:$12 sps:$4 sm:$0xff]   ;;  %v563_v11 = vld [vmem:[#allocation2 + $0x64] ss:$12 sps:$4 sm:$0xff]  }
  0x17   :  { %364 = vmatprep.subr.bf16.mxu0 %v554_v4  ;;  %522 = vmatprep.subr.bf16.mxu1 %v577_v10  ;;  %v579_v12 = vld [vmem:[#allocation2 + $0x8] ss:$12 sps:$4 sm:$0xff]   ;;  %v565_v13 = vld [vmem:[#allocation2 + $0x60] ss:$12 sps:$4 sm:$0xff]   ;;  %v568_v17 = vld [vmem:[#allocation2 + $0x78] ss:$12 sps:$4 sm:$0xff]  }
  0x18   :  { %v566_v14 = vld [vmem:[#allocation2 + $0x7c] ss:$12 sps:$4 sm:$0xff]   ;;  %523 = vmatpush3.bf16.msra.mxu1 %v579_v12  ;;  %v582_v15 = vld [vmem:[#allocation2 + $0xe0] ss:$12 sps:$4 sm:$0xff]   ;;  %v587_v18 = vld [vmem:[#allocation2 + $0xf8] ss:$12 sps:$4 sm:$0xff]  }
  0x19   :  { %v584_v16 = vld [vmem:[#allocation2 + $0x20] ss:$12 sps:$4 sm:$0xff]   ;;  %524 = vmatprep.subr.bf16.mxu1 %v582_v15  ;;  %v589_v19 = vld [vmem:[#allocation2 + $0x38] ss:$12 sps:$4 sm:$0xff]   ;;  %v592_v21 = vld [vmem:[#allocation2 + $0x110] ss:$12 sps:$4 sm:$0xff]  }
  0x1a   :  { %365 = vmatpush1.bf16.msra.mxu0 %v556_v5  ;;  %v569_v20 = vld [vmem:[#allocation2 + $0x94] ss:$12 sps:$4 sm:$0xff]   ;;  %v571_v22 = vld [vmem:[#allocation2 + $0x90] ss:$12 sps:$4 sm:$0xff]   ;;  %v572_v24 = vld [vmem:[#allocation2 + $0xac] ss:$12 sps:$4 sm:$0xff]  }
  0x1b   :  { %366 = vmatprep.subr.bf16.mxu0 %v557_v6  ;;  %v594_v23 = vld [vmem:[#allocation2 + $0x50] ss:$12 sps:$4 sm:$0xff]   ;;  %v597_v25 = vld [vmem:[#allocation2 + $0x128] ss:$12 sps:$4 sm:$0xff]   ;;  %v602_v29 = vld [vmem:[#allocation2 + $0x140] ss:$12 sps:$4 sm:$0xff]  }
  0x1c   :  { %525 = vmatpush3.bf16.msra.mxu1 %v584_v16  ;;  %v574_v26 = vld [vmem:[#allocation2 + $0xa8] ss:$12 sps:$4 sm:$0xff]   ;;  %v575_v28 = vld [vmem:[#allocation2 + $0xc4] ss:$12 sps:$4 sm:$0xff]   ;;  %v578_v30 = vld [vmem:[#allocation2 + $0xc0] ss:$12 sps:$4 sm:$0xff]  }
  0x1d   :  { %526 = vmatprep.subr.bf16.mxu1 %v587_v18  ;;  %v599_v27 = vld [vmem:[#allocation2 + $0x68] ss:$12 sps:$4 sm:$0xff]   ;;  %v604_v32 = vld [vmem:[#allocation2 + $0x80] ss:$12 sps:$4 sm:$0xff]   ;;  %v607_v33 = vld [vmem:[#allocation2 + $0x158] ss:$12 sps:$4 sm:$0xff]  }
  0x1e   :  { %367 = vmatpush1.bf16.msra.mxu0 %v559_v7  ;;  %v580_v31 = vld [vmem:[#allocation2 + $0xdc] ss:$12 sps:$4 sm:$0xff]   ;;  %v583_v34 = vld [vmem:[#allocation2 + $0xd8] ss:$12 sps:$4 sm:$0xff]   ;;  %v585_v36 = vld [vmem:[#allocation2 + $0xf4] ss:$12 sps:$4 sm:$0xff]  }
  0x1f   :  { %368 = vmatprep.subr.bf16.mxu0 %v560_v8  ;;  %v609_v35 = vld [vmem:[#allocation2 + $0x98] ss:$12 sps:$4 sm:$0xff]   ;;  %v612_v37 = vld [vmem:[#allocation2 + $0x170] ss:$12 sps:$4 sm:$0xff]   ;;  %v593_v41 = vld [vmem:[#allocation2 + $0x108] ss:$12 sps:$4 sm:$0xff]  }
  0x20   :  { %527 = vmatpush3.bf16.msra.mxu1 %v589_v19  ;;  %v588_v38 = vld [vmem:[#allocation2 + $0xf0] ss:$12 sps:$4 sm:$0xff]   ;;  %v590_v40 = vld [vmem:[#allocation2 + $0x10c] ss:$12 sps:$4 sm:$0xff]   ;;  %v605_v46 = vld [vmem:[#allocation2 + $0x154] ss:$12 sps:$4 sm:$0xff]  }
  0x21   :  { %528 = vmatprep.subr.bf16.mxu1 %v592_v21  ;;  %v614_v39 = vld [vmem:[#allocation2 + $0xb0] ss:$12 sps:$4 sm:$0xff]   ;;  %v598_v43 = vld [vmem:[#allocation2 + $0x120] ss:$12 sps:$4 sm:$0xff]   ;;  %v603_v45 = vld [vmem:[#allocation2 + $0x138] ss:$12 sps:$4 sm:$0xff]  }
  0x22   :  { %369 = vmatpush1.bf16.msra.mxu0 %v562_v9  ;;  %v595_v42 = vld [vmem:[#allocation2 + $0x124] ss:$12 sps:$4 sm:$0xff]   ;;  %v600_v44 = vld [vmem:[#allocation2 + $0x13c] ss:$12 sps:$4 sm:$0xff]   ;;  %v610_v48 = vld [vmem:[#allocation2 + $0x16c] ss:$12 sps:$4 sm:$0xff]  }
  0x23   :  { %370 = vmatprep.subr.bf16.mxu0 %v563_v11  ;;  %v608_v47 = vld [vmem:[#allocation2 + $0x150] ss:$12 sps:$4 sm:$0xff]   ;;  %v613_v49 = vld [vmem:[#allocation2 + $0x168] ss:$12 sps:$4 sm:$0xff]   ;;  %v29_v51 = vand.u32 127, %v28_v50  ;;  %s668_s0 = smov [#allocation5]  }
  0x24   :  { %529 = vmatpush3.bf16.msra.mxu1 %v594_v23  ;;  %v667_v54 = vmov 1.0|1.0   ;;  %s455_s1 = sshll.u32 %s668_s0, 4  ;;  %s456_s1 = int_to_ptr.vmem [resolvable:$true] %s455_s1 }
  0x25   :  { %530 = vmatprep.subr.bf16.mxu1 %v597_v25  ;;  %v30_v52 = vadd.s32 128, %v29_v51  ;;  %s637_s25 = scalar_lea.vmem %s456_s1, 384  ;;  %p642_p9 = scmp.lt.s32.totalorder %s456_s1, %s456_s1 }
  0x26   :  { %371 = vmatpush1.bf16.msra.mxu0 %v565_v13  ;;  %p638_p8 = scmp.ne.s32.totalorder %s456_s1, %s637_s25  ;;  %p643_p10 = scmp.lt.s32.totalorder %s637_s25, %s637_s25 }
  0x27   :  { %372 = vmatprep.subr.bf16.mxu0 %v566_v14 }
  0x28   :  { %531 = vmatpush3.bf16.msra.mxu1 %v599_v27  ;;  %p644_p11 = por %p643_p10, %p642_p9 }
  0x29   :  { %532 = vmatprep.subr.bf16.mxu1 %v602_v29 }
  0x2a   :  { %373 = vmatpush1.bf16.msra.mxu0 %v568_v17  ;;  %p645_p12 = pnand %p644_p11, %p638_p8 }
  0x2b   :  { %374 = vmatprep.subr.bf16.mxu0 %v569_v20 }
  0x2c   :  { %533 = vmatpush3.bf16.msra.mxu1 %v604_v32 }
  0x2d   :  { %534 = vmatprep.subr.bf16.mxu1 %v607_v33 }
  0x2e   :  { %375 = vmatpush1.bf16.msra.mxu0 %v571_v22 }
  0x2f   :  { %376 = vmatprep.subr.bf16.mxu0 %v572_v24 }
  0x30   :  { %535 = vmatpush3.bf16.msra.mxu1 %v609_v35 }
  0x31   :  { %536 = vmatprep.subr.bf16.mxu1 %v612_v37 }
  0x32   :  { %377 = vmatpush1.bf16.msra.mxu0 %v574_v26 }
  0x33   :  { %378 = vmatprep.subr.bf16.mxu0 %v575_v28 }
  0x34   :  { %537 = vmatpush3.bf16.msra.mxu1 %v614_v39 }
  0x36   :  { %379 = vmatpush1.bf16.msra.mxu0 %v578_v30 }
  0x37   :  { %380 = vmatprep.subr.bf16.mxu0 %v580_v31 }
  0x3a   :  { %381 = vmatpush1.bf16.msra.mxu0 %v583_v34 }
  0x3b   :  { %382 = vmatprep.subr.bf16.mxu0 %v585_v36 }
  0x3e   :  { %383 = vmatpush1.bf16.msra.mxu0 %v588_v38 }
  0x3f   :  { %384 = vmatprep.subr.bf16.mxu0 %v590_v40 }
  0x42   :  { %385 = vmatpush1.bf16.msra.mxu0 %v593_v41 }
  0x43   :  { %386 = vmatprep.subr.bf16.mxu0 %v595_v42 }
  0x46   :  { %387 = vmatpush1.bf16.msra.mxu0 %v598_v43 }
  0x47   :  { %388 = vmatprep.subr.bf16.mxu0 %v600_v44 }
  0x4a   :  { %389 = vmatpush1.bf16.msra.mxu0 %v603_v45 }
  0x4b   :  { %390 = vmatprep.subr.bf16.mxu0 %v605_v46 }
  0x4e   :  { %391 = vmatpush1.bf16.msra.mxu0 %v608_v47 }
  0x4f   :  { %392 = vmatprep.subr.bf16.mxu0 %v610_v48 }
  0x52   :  { %393 = vmatpush1.bf16.msra.mxu0 %v613_v49 }
  0x94   :  { %v33_v53 = vpop.permute.xlu0 %32 }
  0x95   :  { %vm34_vm0 = vcmp.eq.s32.totalorder %v29_v51, %v33_v53  ;;  %vm35_vm1 = vcmp.eq.s32.totalorder %v30_v52, %v33_v53 }
  0x96   :  { %vm516_vm2 = vmpackc.low %vm34_vm0, %vm34_vm0 }
  0x97   :  { %vm514_vm3 = vmpackc.low %vm35_vm1, %vm35_vm1 }
  0x98   :  { %515 = vmatprep.mubr.msk.bf16.mxu0 %vm514_vm3, %v667_v54  ;;  %519 = vmatprep.mubr.msk.bf16.mxu1 %vm514_vm3, %v667_v54 }
  0x99   :  { %517 = vmatmul.mubr.msk.bf16.vlgmr.msra.gmra.mrb[0].mxu0 %vm516_vm2, %v667_v54  ;;  %521 = vmatmul.mubr.msk.bf16.vlgmr.msra.gmra.mrb[0].mxu1 %vm516_vm2, %v667_v54 }
 0x16c   :  { %v396_v55 = vpop.f32.mrb[0].mxu0  ;;  %v538_v56 = vpop.f32.mrb[0].mxu1 }
 0x16d   :  { %v443_v57 = vmax.f32 %v396_v55, 0.0  ;;  %v398_v58 = vpop.f32.mrb[1].mxu0  ;;  %v539_v59 = vpop.f32.mrb[1].mxu1 }
 0x16e   :  { %v444_v60 = vmax.f32 %v398_v58, 0.0  ;;  %v540_v61 = vadd.f32 %v539_v59, %v538_v56  ;;  %v400_v62 = vpop.f32.mrb[2].mxu0  ;;  %v541_v63 = vpop.f32.mrb[2].mxu1 }
 0x16f   :  { %446 = vst [vmem:[#allocation5] sm:$0xff] %v443_v57  ;;  %v401_v0 = vpop.f32.mrb[3].mxu0  ;;  %v542_v1 = vpop.f32.mrb[3].mxu1 }
 0x170   :  { %447 = vst [vmem:[#allocation5 + $0x8] sm:$0xff] %v444_v60  ;;  %v445_v2 = vmax.f32 %v540_v61, 0.0 }
 0x172   :  { %448 = vst [vmem:[#allocation5 + $0x10] sm:$0xff] %v445_v2 }
 0x173   :  { %648 = shalt.err (!%p645_p12)
}
 0x174   :  { %s649_s28 = scalar_lea.hbm %s713_s2, 384 }
 0x175   :  { %p650_p13 = scmp.ne.s32.totalorder %s713_s2, %s649_s28  ;;  %p653_p0 = scmp.lt.u32.totalorder %s649_s28, %s713_s2 }
 0x177   :  { %p655_p1 = pnand %p653_p0, %p650_p13 }
 0x179   :  { %658 = shalt.err (!%p655_p1)
}
 0x17a   :  { %458 = dma.vmem_to_hbm [thread:$0]  %s456_s1, 384, %s713_s2, [#allocation4]  }
 0x17b   :  { %661 = dma.done.wait [#allocation4], 384  }
 0x17c   :  { %662 = vsyncadd [#allocation4], 4294966912 }
 0x17d   :  { %462 = vsyncpa [#allocation3], 1 }
 0x17e   :  { %463 = vsyncpa [#allocation4], 1 }

</bundles_post_ra>
